<compile_context>
chip_gen: v7x
topology: tpu7x:2x2x1
jax: 0.10.0
libtpu: 0.0.40
codegen_flags: <defaults>
</compile_context>

<pallas_src>
import functools

import jax
import jax.numpy as jnp
from jax.experimental import pallas as pl
from jax.experimental.pallas import tpu as pltpu

LANES = 128
SUBLANES = 8
CHUNK_ROWS = 1024                    # in-kernel fold granularity (512 KiB f32)
VMEM_INPUT_BUDGET = 32 * 1024 * 1024  # double-buffered input bytes budget


def _round_up(x, m):
    return ((x + m - 1) // m) * m


def _wl2_kernel(tm, chunk_rows, valid_rows, p_ref, t_ref, o_ref):
    """Accumulate sum((p - t)^2) of one (tm, 128) tile into an (8, 128) block.

    o_ref is resident across the reduction axis (grid axis 1).  Rows at or
    beyond `valid_rows` (boundary blocks of a non-multiple-of-tm input) are
    masked to zero, so no HBM-side padding is ever needed.
    """
    i = pl.program_id(0)
    j = pl.program_id(1)
    nj = pl.num_programs(1)

    @pl.when(j == 0)
    def _init():
        o_ref[...] = jnp.zeros_like(o_ref)

    start = (i * nj + j) * tm          # first global row of this tile
    n_chunks = tm // chunk_rows

    def accumulate(r0, masked):
        p = p_ref[pl.ds(r0, chunk_rows), :].astype(jnp.float32)
        t = t_ref[pl.ds(r0, chunk_rows), :].astype(jnp.float32)
        d = p - t
        dd = d * d
        if masked:
            row = (start + r0) + jax.lax.broadcasted_iota(
                jnp.int32, (chunk_rows, LANES), 0)
            dd = jnp.where(row < valid_rows, dd, 0.0)
        # (chunk, 128) -> (chunk/8, 8, 128) -> (8, 128): pure vreg-wise adds,
        # the (8,128) tiles stay intact (no cross-lane movement).
        o_ref[...] += jnp.sum(dd.reshape(-1, SUBLANES, LANES), axis=0)

    @pl.when(start + tm <= valid_rows)
    def _full_tile():
        if n_chunks == 1:
            accumulate(0, masked=False)
        else:
            @pl.loop(0, n_chunks)
            def _(c):
                accumulate(pl.multiple_of(c * chunk_rows, chunk_rows),
                           masked=False)

    @pl.when(start + tm > valid_rows)
    def _boundary_tile():
        if n_chunks == 1:
            accumulate(0, masked=True)
        else:
            @pl.loop(0, n_chunks)
            def _(c):
                accumulate(pl.multiple_of(c * chunk_rows, chunk_rows),
                           masked=True)


@functools.partial(jax.jit,
                   static_argnames=("tile_rows", "num_splits", "core_parallel"))
def weighted_l2_loss(pred, target, weight=1.0, *, tile_rows=None, num_splits=1,
                     core_parallel=False):
    """mean(weight * (pred - target)**2) computed with a Pallas TPU kernel."""
    assert pred.shape == target.shape, "pred/target shape mismatch"
    total = int(pred.size)
    assert total > 0

    p_item = jnp.dtype(pred.dtype).itemsize
    t_item = jnp.dtype(target.dtype).itemsize
    if tile_rows is None:
        # ~4 MiB per input block for f32, same byte volume for bf16.
        tile_rows = 8192 if max(p_item, t_item) >= 4 else 16384

    p_flat = pred.reshape(-1)
    t_flat = target.reshape(-1)

    main_total = (total // LANES) * LANES
    rows_main = main_total // LANES

    sumsq = jnp.float32(0.0)

    if rows_main > 0:
        if main_total == total:
            p2 = p_flat.reshape(rows_main, LANES)   # zero-copy view under jit
            t2 = t_flat.reshape(rows_main, LANES)
        else:
            # TODO(synk): the total % 128 != 0 path still pays one prefix-slice
            # copy per input (vs. the old full jnp.pad of both arrays); a fully
            # zero-copy version would need a 1-D / manual-DMA kernel.
            p2 = p_flat[:main_total].reshape(rows_main, LANES)
            t2 = t_flat[:main_total].reshape(rows_main, LANES)

        # ---- tile / split selection ---------------------------------------
        splits = max(1, min(int(num_splits), max(1, rows_main // SUBLANES)))

        bytes_per_row_2buf = 2 * LANES * (p_item + t_item)   # double-buffered
        tm_vmem_cap = max(
            SUBLANES,
            (VMEM_INPUT_BUDGET // bytes_per_row_2buf) // SUBLANES * SUBLANES)

        def pick(splits_):
            tm_ = _round_up(min(int(tile_rows), pl.cdiv(rows_main, splits_)),
                            SUBLANES)
            tm_ = min(tm_, tm_vmem_cap)
            bps_ = pl.cdiv(rows_main, splits_ * tm_)
            return tm_, bps_

        tm, bps = pick(splits)
        # Never schedule a split whose blocks lie entirely past the data.
        while splits > 1 and (splits - 1) * bps * tm >= rows_main:
            splits -= 1
            tm, bps = pick(splits)

        chunk_rows = (CHUNK_ROWS
                      if (tm > CHUNK_ROWS and tm % CHUNK_ROWS == 0) else tm)

        # ---- compiler params ------------------------------------------------
        block_bytes = tm * LANES * (p_item + t_item)
        vmem_limit = int(min(60 << 20, max(2 * block_bytes + (4 << 20),
                                           16 << 20)))
        if core_parallel and splits > 1:
            # v7x: actually shard the partial sums across the two TensorCores.
            dim_sem = (pltpu.CORE_PARALLEL, pltpu.ARBITRARY)
        else:
            dim_sem = ("parallel", "arbitrary")

        in_map = lambda i, j: (i * bps + j, 0)

        partials = pl.pallas_call(
            functools.partial(_wl2_kernel, tm, chunk_rows, rows_main),
            out_shape=jax.ShapeDtypeStruct((splits * SUBLANES, LANES),
                                           jnp.float32),
            grid_spec=pltpu.PrefetchScalarGridSpec(
                num_scalar_prefetch=0,
                grid=(splits, bps),
                in_specs=[
                    pl.BlockSpec((tm, LANES), in_map),   # pred tile
                    pl.BlockSpec((tm, LANES), in_map),   # target tile
                ],
                out_specs=pl.BlockSpec((SUBLANES, LANES), lambda i, j: (i, 0)),
            ),
            compiler_params=pltpu.CompilerParams(
                dimension_semantics=dim_sem,
                vmem_limit_bytes=vmem_limit,
            ),
        )(p2, t2)
        sumsq = jnp.sum(partials)

    if main_total != total:
        # < 128 leftover elements: negligible, fuses into the jitted epilogue.
        dt = (p_flat[main_total:].astype(jnp.float32)
              - t_flat[main_total:].astype(jnp.float32))
        sumsq = sumsq + jnp.sum(dt * dt)

    w = jnp.asarray(weight, dtype=jnp.float32)
    return (w * sumsq) * jnp.float32(1.0 / total)


if __name__ == "__main__":
    key = jax.random.PRNGKey(0)
    k1, k2, k3, k4, k5, k6 = jax.random.split(key, 6)
    weight = 0.5

    # 1) Basic NCHW case (single-tile path, zero-copy reshape).
    pred = jax.random.normal(k1, (2, 4, 16, 16), dtype=jnp.float32)
    target = jax.random.normal(k2, (2, 4, 16, 16), dtype=jnp.float32)
    loss = weighted_l2_loss(pred, target, weight)
    jax.block_until_ready(loss)
    ref = jnp.mean(weight * (pred - target) ** 2)
    assert jnp.allclose(loss, ref, rtol=1e-5, atol=1e-6), (loss, ref)

    # 2) Multi-block reduction path (small tile_rows to exercise grid axis 1).
    loss2 = weighted_l2_loss(pred, target, weight, tile_rows=8)
    jax.block_until_ready(loss2)
    assert jnp.allclose(loss2, ref, rtol=1e-5, atol=1e-6), (loss2, ref)

    # 3) Two-way split (partial-sum parallel axis).
    loss3 = weighted_l2_loss(pred, target, weight, tile_rows=8, num_splits=2)
    jax.block_until_ready(loss3)
    assert jnp.allclose(loss3, ref, rtol=1e-5, atol=1e-6), (loss3, ref)

    # 4) Awkward shape (total % 128 != 0): boundary-block masking + tiny tail,
    #    no jnp.pad of the inputs.
    pred4 = jax.random.normal(k3, (2, 3, 17, 19), dtype=jnp.float32)
    target4 = jax.random.normal(k4, (2, 3, 17, 19), dtype=jnp.float32)
    loss4 = weighted_l2_loss(pred4, target4, weight)
    jax.block_until_ready(loss4)
    ref4 = jnp.mean(weight * (pred4 - target4) ** 2)
    assert jnp.allclose(loss4, ref4, rtol=1e-5, atol=1e-6), (loss4, ref4)

    # 5) bf16 inputs streamed as bf16 (upcast to f32 only inside the kernel).
    loss5 = weighted_l2_loss(pred.astype(jnp.bfloat16),
                             target.astype(jnp.bfloat16), weight)
    jax.block_until_ready(loss5)
    ref5 = jnp.mean(
        weight
        * (pred.astype(jnp.bfloat16).astype(jnp.float32)
           - target.astype(jnp.bfloat16).astype(jnp.float32)) ** 2)
    assert jnp.allclose(loss5, ref5, rtol=2e-2, atol=1e-3), (loss5, ref5)

    # 6) Larger input that exercises the in-kernel chunked fold (pl.loop).
    pred6 = jax.random.normal(k5, (2, 4, 128, 256), dtype=jnp.float32)
    target6 = jax.random.normal(k6, (2, 4, 128, 256), dtype=jnp.float32)
    loss6 = weighted_l2_loss(pred6, target6, weight)
    jax.block_until_ready(loss6)
    ref6 = jnp.mean(weight * (pred6 - target6) ** 2)
    assert jnp.allclose(loss6, ref6, rtol=1e-5, atol=1e-6), (loss6, ref6)

    print("KERNEL_OK")
</pallas_src>

<mosaic_0001>
module attributes {stable_mosaic.version = 11 : i64} {
  func.func @_wl2_kernel(%arg0: i32, %arg1: i32, %arg2: memref<16x128xf32, #tpu.memory_space<vmem>>, %arg3: memref<16x128xf32, #tpu.memory_space<vmem>>, %arg4: memref<8x128xf32, #tpu.memory_space<vmem>>) attributes {dimension_semantics = [#tpu.dimension_semantics<parallel>, #tpu.dimension_semantics<arbitrary>], iteration_bounds = array<i64: 1, 1>, scalar_prefetch = 0 : i64, scratch_operands = 0 : i64, tpu.core_type = #tpu.core_type<tc>, window_params = [{transform_indices = @transform_0, window_bounds = array<i64: 16, 128>}, {transform_indices = @transform_1, window_bounds = array<i64: 16, 128>}, {transform_indices = @transform_2, window_bounds = array<i64: 8, 128>}]} {
    %c0_i32 = arith.constant 0 : i32
    %0 = arith.cmpi eq, %arg1, %c0_i32 : i32
    %1 = arith.extui %0 : i1 to i32
    %c0_i32_0 = arith.constant 0 : i32
    %2 = arith.cmpi ne, %1, %c0_i32_0 : i32
    scf.if %2 {
      %cst = arith.constant 0.000000e+00 : f32
      %14 = vector.broadcast %cst : f32 to vector<8x128xf32>
      %c0 = arith.constant 0 : index
      %c0_7 = arith.constant 0 : index
      %15 = vector.load %arg4[%c0, %c0_7] : memref<8x128xf32, #tpu.memory_space<vmem>>, vector<8x128xf32>
      tpu.vector_store %arg4[%c0, %c0_7], %14 {strides = array<i32>} : memref<8x128xf32, #tpu.memory_space<vmem>>, vector<8x128xf32>,
    } else {
    }
    %c1_i32 = arith.constant 1 : i32
    %3 = arith.muli %arg0, %c1_i32 : i32
    %4 = arith.addi %3, %arg1 : i32
    %c16_i32 = arith.constant 16 : i32
    %5 = arith.muli %4, %c16_i32 : i32
    %c16_i32_1 = arith.constant 16 : i32
    %6 = arith.addi %5, %c16_i32_1 : i32
    %c16_i32_2 = arith.constant 16 : i32
    %7 = arith.cmpi sle, %6, %c16_i32_2 : i32
    %8 = arith.extui %7 : i1 to i32
    %c0_i32_3 = arith.constant 0 : i32
    %9 = arith.cmpi ne, %8, %c0_i32_3 : i32
    scf.if %9 {
      %c0 = arith.constant 0 : index
      %c0_7 = arith.constant 0 : index
      %14 = vector.load %arg2[%c0, %c0_7] : memref<16x128xf32, #tpu.memory_space<vmem>>, vector<16x128xf32>
      %c0_8 = arith.constant 0 : index
      %c0_9 = arith.constant 0 : index
      %15 = vector.load %arg3[%c0_8, %c0_9] : memref<16x128xf32, #tpu.memory_space<vmem>>, vector<16x128xf32>
      %16 = arith.subf %14, %15 : vector<16x128xf32>
      %17 = arith.mulf %16, %16 : vector<16x128xf32>
      %c0_10 = arith.constant 0 : index
      %c0_11 = arith.constant 0 : index
      %18 = vector.load %arg4[%c0_10, %c0_11] : memref<8x128xf32, #tpu.memory_space<vmem>>, vector<8x128xf32>
      %19 = vector.shape_cast %17 : vector<16x128xf32> to vector<2x8x128xf32>
      %cst = arith.constant dense<0.000000e+00> : vector<8x128xf32>
      %20 = vector.multi_reduction <add>, %19, %cst [0] : vector<2x8x128xf32> to vector<8x128xf32>
      %21 = arith.addf %18, %20 : vector<8x128xf32>
      %c0_12 = arith.constant 0 : index
      %c0_13 = arith.constant 0 : index
      %22 = vector.load %arg4[%c0_12, %c0_13] : memref<8x128xf32, #tpu.memory_space<vmem>>, vector<8x128xf32>
      tpu.vector_store %arg4[%c0_12, %c0_13], %21 {strides = array<i32>} : memref<8x128xf32, #tpu.memory_space<vmem>>, vector<8x128xf32>,
    } else {
    }
    %c16_i32_4 = arith.constant 16 : i32
    %10 = arith.addi %5, %c16_i32_4 : i32
    %c16_i32_5 = arith.constant 16 : i32
    %11 = arith.cmpi sgt, %10, %c16_i32_5 : i32
    %12 = arith.extui %11 : i1 to i32
    %c0_i32_6 = arith.constant 0 : i32
    %13 = arith.cmpi ne, %12, %c0_i32_6 : i32
    scf.if %13 {
      %c0 = arith.constant 0 : index
      %c0_7 = arith.constant 0 : index
      %14 = vector.load %arg2[%c0, %c0_7] : memref<16x128xf32, #tpu.memory_space<vmem>>, vector<16x128xf32>
      %c0_8 = arith.constant 0 : index
      %c0_9 = arith.constant 0 : index
      %15 = vector.load %arg3[%c0_8, %c0_9] : memref<16x128xf32, #tpu.memory_space<vmem>>, vector<16x128xf32>
      %16 = arith.subf %14, %15 : vector<16x128xf32>
      %17 = arith.mulf %16, %16 : vector<16x128xf32>
      %c0_i32_10 = arith.constant 0 : i32
      %18 = arith.addi %5, %c0_i32_10 : i32
      %19 = tpu.iota {dimensions = array<i32: 0>} : vector<16x128xi32>
      %20 = vector.broadcast %18 : i32 to vector<16x128xi32>
      %21 = arith.addi %20, %19 : vector<16x128xi32>
      %c16_i32_11 = arith.constant 16 : i32
      %22 = vector.broadcast %c16_i32_11 : i32 to vector<16x128xi32>
      %23 = arith.cmpi slt, %21, %22 : vector<16x128xi32>
      %cst = arith.constant 0.000000e+00 : f32
      %24 = vector.broadcast %cst : f32 to vector<16x128xf32>
      %25 = arith.select %23, %17, %24 : vector<16x128xi1>, vector<16x128xf32>
      %c0_12 = arith.constant 0 : index
      %c0_13 = arith.constant 0 : index
      %26 = vector.load %arg4[%c0_12, %c0_13] : memref<8x128xf32, #tpu.memory_space<vmem>>, vector<8x128xf32>
      %27 = vector.shape_cast %25 : vector<16x128xf32> to vector<2x8x128xf32>
      %cst_14 = arith.constant dense<0.000000e+00> : vector<8x128xf32>
      %28 = vector.multi_reduction <add>, %27, %cst_14 [0] : vector<2x8x128xf32> to vector<8x128xf32>
      %29 = arith.addf %26, %28 : vector<8x128xf32>
      %c0_15 = arith.constant 0 : index
      %c0_16 = arith.constant 0 : index
      %30 = vector.load %arg4[%c0_15, %c0_16] : memref<8x128xf32, #tpu.memory_space<vmem>>, vector<8x128xf32>
      tpu.vector_store %arg4[%c0_15, %c0_16], %29 {strides = array<i32>} : memref<8x128xf32, #tpu.memory_space<vmem>>, vector<8x128xf32>,
    } else {
    }
    return
  }
  func.func @transform_0(%arg0: i32, %arg1: i32) -> (i32, i32) {
    %c1_i32 = arith.constant 1 : i32
    %0 = arith.muli %arg0, %c1_i32 : i32
    %1 = arith.addi %0, %arg1 : i32
    %c0_i32 = arith.constant 0 : i32
    %c0_i32_0 = arith.constant 0 : i32
    return %1, %c0_i32 : i32, i32
  }
  func.func @transform_1(%arg0: i32, %arg1: i32) -> (i32, i32) {
    %c1_i32 = arith.constant 1 : i32
    %0 = arith.muli %arg0, %c1_i32 : i32
    %1 = arith.addi %0, %arg1 : i32
    %c0_i32 = arith.constant 0 : i32
    %c0_i32_0 = arith.constant 0 : i32
    return %1, %c0_i32 : i32, i32
  }
  func.func @transform_2(%arg0: i32, %arg1: i32) -> (i32, i32) {
    %c0_i32 = arith.constant 0 : i32
    %c0_i32_0 = arith.constant 0 : i32
    return %arg0, %c0_i32 : i32, i32
  }
}

</mosaic_0001>

<bundles_post_ra>
// kernel: weighted_l2_loss.1
= control target key start
LH: loop header
LB: loop body
LE: loop exit
PB: predicated region body
PF: predicated region fallthrough
CT: control target
= control target key end

     0   :  { %s152_s0 = inlined_call_operand.vmem [shape: f32[16,128], index: 0, kind: input, shape index: {}]   ;;  %s153_s1 = inlined_call_operand.vmem [shape: f32[16,128], index: 1, kind: input, shape index: {}]   ;;  %s154_s2 = inlined_call_operand.vmem [shape: f32[8,128], index: 2, kind: output, shape index: {}]  }
   0x1   :  { %v67_v0 = vld [vmem:[%s152_s0] sm:$0xff]  ;;  %v68_v1 = vld [vmem:[%s152_s0 + $0x8] sm:$0xff] }
   0x2   :  { %v69_v2 = vld [vmem:[%s153_s1] sm:$0xff]  ;;  %v70_v3 = vld [vmem:[%s153_s1 + $0x8] sm:$0xff] }
   0x3   :  { %v71_v4 = vsub.f32 %v67_v0, %v69_v2  ;;  %v72_v5 = vsub.f32 %v68_v1, %v70_v3 }
   0x5   :  { %v73_v6 = vmul.f32 %v71_v4, %v71_v4  ;;  %v74_v7 = vmul.f32 %v72_v5, %v72_v5 }
   0x7   :  { %v76_v8 = vadd.f32 %v74_v7, %v73_v6 }
   0x9   :  { %78 = vst [vmem:[%s154_s2] sm:$0xff] %v76_v8 }

</bundles_post_ra>
